<compile_context>
chip_gen: v6e
topology: v6e:2x2x1
jax: 0.10.0
libtpu: 0.0.40
codegen_flags: <defaults>
</compile_context>

<pallas_src>
import jax
import jax.numpy as jnp
from jax.experimental import pallas as pl
from jax.experimental.pallas import tpu as pltpu

_MIB = 1024 * 1024


def _round_up(x, m):
    return -(-x // m) * m


def _prompt_cat_kernel(prefix_ref, ctx_ref, suffix_ref, out_ref):
    tc, _, d = out_ref.shape
    n_ctx = ctx_ref.shape[1]
    # SOS token row.
    out_ref[:, 0:1, :] = prefix_ref[...].astype(out_ref.dtype)
    # Learned context rows; broadcast over the class tile when the context is
    # generic (block (1, n_ctx, D)); a no-op when class-specific (tc, n_ctx, D).
    out_ref[:, 1:1 + n_ctx, :] = jnp.broadcast_to(
        ctx_ref[...], (tc, n_ctx, d)).astype(out_ref.dtype)
    # Class-name + EOS + padding rows.
    out_ref[:, 1 + n_ctx:, :] = suffix_ref[...].astype(out_ref.dtype)


def _xla_forward(prefix, ctx3, suffix):
    n_cls = prefix.shape[0]
    ctx_b = jnp.broadcast_to(ctx3, (n_cls,) + ctx3.shape[1:]).astype(prefix.dtype)
    return jnp.concatenate([prefix, ctx_b, suffix], axis=1)


def prompt_learner_forward(prefix, ctx, suffix, *,
                           vmem_block_budget_bytes=None,
                           use_xla_below_bytes=1 * _MIB,
                           min_grid_steps=4):
    """prefix: (n_cls, 1, D), ctx: (n_ctx, D) or (n_cls, n_ctx, D),
    suffix: (n_cls, S, D)  ->  prompts: (n_cls, 1 + n_ctx + S, D)."""
    n_cls, one, d = prefix.shape
    assert one == 1
    csc = (ctx.ndim == 3)                       # class-specific context (CSC)
    ctx3 = ctx if csc else ctx[None]            # (1, n_ctx, D) when generic
    n_ctx = ctx3.shape[1]
    s_len = suffix.shape[1]
    total_len = 1 + n_ctx + s_len
    itemsize = jnp.dtype(prefix.dtype).itemsize

    out_bytes = n_cls * total_len * d * itemsize
    if out_bytes < use_xla_below_bytes:
        # Fixed pallas_call overhead dominates at tiny sizes; fused XLA concat
        # is strictly faster there.
        return _xla_forward(prefix, ctx3, suffix)

    # --- per-generation VMEM sizing -------------------------------------
    try:  # 128 MiB on v5e/v6e, 64 MiB per TensorCore on v7x.
        vmem_cap = int(pltpu.get_tpu_info().vmem_capacity_bytes)
    except Exception:
        vmem_cap = 64 * _MIB                    # conservative (v7x)
    vmem_limit = max(32 * _MIB, min(vmem_cap - 16 * _MIB, 96 * _MIB))
    if vmem_block_budget_bytes is None:
        # Total resident bytes for all (double-buffered) pipeline blocks:
        # ~88 MiB on v5e/v6e, ~40 MiB on v7x.
        vmem_block_budget_bytes = vmem_limit - 8 * _MIB

    # Per-class VMEM bytes of one pipeline step, honouring (8, 128) tiling:
    # the (tc, 1, D) prefix block pads each class plane to 8 sublanes and the
    # seq axes of suffix / output blocks round up to multiples of 8.
    d_pad = _round_up(d, 128)
    per_cls_rows = (8 + _round_up(s_len, 8) + _round_up(total_len, 8)
                    + (_round_up(n_ctx, 8) if csc else 0))
    per_cls = per_cls_rows * d_pad * itemsize
    shared = 0 if csc else _round_up(n_ctx, 8) * d_pad * itemsize
    tc = int(max(1, (vmem_block_budget_bytes - 2 * shared) // (2 * per_cls)))
    tc = min(tc, n_cls)
    # Keep >= min_grid_steps grid steps so the "parallel" class axis can be
    # sharded across both v7x TensorCores (extra steps cost ~0.35 us each,
    # noise on v5e/v6e).
    if n_cls > 1:
        tc = min(tc, max(1, -(-n_cls // max(2, int(min_grid_steps)))))
    grid_c = -(-n_cls // tc)                    # ragged final tile is fine

    if csc:
        ctx_spec = pl.BlockSpec((tc, n_ctx, d), lambda i: (i, 0, 0))
    else:
        ctx_spec = pl.BlockSpec((1, n_ctx, d), lambda i: (0, 0, 0))

    return pl.pallas_call(
        _prompt_cat_kernel,
        out_shape=jax.ShapeDtypeStruct((n_cls, total_len, d), prefix.dtype),
        grid=(grid_c,),
        in_specs=[
            pl.BlockSpec((tc, 1, d), lambda i: (i, 0, 0)),
            ctx_spec,
            pl.BlockSpec((tc, s_len, d), lambda i: (i, 0, 0)),
        ],
        out_specs=pl.BlockSpec((tc, total_len, d), lambda i: (i, 0, 0)),
        compiler_params=pltpu.CompilerParams(
            dimension_semantics=("parallel",),   # v7x: shard classes over TCs
            vmem_limit_bytes=int(vmem_limit),
        ),
    )(prefix, ctx3, suffix)


if __name__ == "__main__":
    key = jax.random.PRNGKey(0)
    k_ctx, k_pre, k_suf, k_csc = jax.random.split(key, 4)

    # Small shapes consistent with the module (n_cls classes, n_ctx context
    # tokens, seq_len total tokens, ctx_dim embedding width).
    n_cls, n_ctx, seq_len, ctx_dim = 10, 4, 16, 128
    s_len = seq_len - 1 - n_ctx

    # Generic (shared) context, std=0.02 init as in CoOp; embeddings random.
    ctx = 0.02 * jax.random.normal(k_ctx, (n_ctx, ctx_dim), dtype=jnp.float32)
    prefix = jax.random.normal(k_pre, (n_cls, 1, ctx_dim), dtype=jnp.float32)
    suffix = jax.random.normal(k_suf, (n_cls, s_len, ctx_dim), dtype=jnp.float32)

    ref = jnp.concatenate(
        [prefix, jnp.broadcast_to(ctx[None], (n_cls, n_ctx, ctx_dim)), suffix],
        axis=1)

    # Generic-context path through the Pallas kernel (force past the tiny-
    # problem XLA fallback; also exercises the ragged final class tile).
    prompts = prompt_learner_forward(prefix, ctx, suffix,
                                     use_xla_below_bytes=0)
    jax.block_until_ready(prompts)
    assert prompts.shape == (n_cls, seq_len, ctx_dim)
    assert jnp.array_equal(prompts, ref)

    # Class-specific-context (CSC) path through the Pallas kernel.
    ctx_csc = 0.02 * jax.random.normal(
        k_csc, (n_cls, n_ctx, ctx_dim), dtype=jnp.float32)
    prompts_csc = prompt_learner_forward(prefix, ctx_csc, suffix,
                                         use_xla_below_bytes=0)
    jax.block_until_ready(prompts_csc)
    ref_csc = jnp.concatenate([prefix, ctx_csc, suffix], axis=1)
    assert jnp.array_equal(prompts_csc, ref_csc)

    # Default path: tiny problem -> fused XLA concat fallback.
    prompts_xla = prompt_learner_forward(prefix, ctx, suffix)
    jax.block_until_ready(prompts_xla)
    assert jnp.array_equal(prompts_xla, ref)

    print("KERNEL_OK")
</pallas_src>

<mosaic_0001>
module attributes {stable_mosaic.version = 11 : i64} {
  func.func @_prompt_cat_kernel(%arg0: i32, %arg1: memref<3x1x128xf32, #tpu.memory_space<vmem>>, %arg2: memref<1x4x128xf32, #tpu.memory_space<vmem>>, %arg3: memref<3x11x128xf32, #tpu.memory_space<vmem>>, %arg4: memref<3x16x128xf32, #tpu.memory_space<vmem>>) attributes {dimension_semantics = [#tpu.dimension_semantics<parallel>], iteration_bounds = array<i64: 4>, scalar_prefetch = 0 : i64, scratch_operands = 0 : i64, tpu.core_type = #tpu.core_type<tc>, window_params = [{transform_indices = @transform_0, window_bounds = array<i64: 3, 1, 128>}, {pipeline_mode = #tpu.pipeline_mode<synchronous>, transform_indices = @transform_1, window_bounds = array<i64: 1, 4, 128>}, {transform_indices = @transform_2, window_bounds = array<i64: 3, 11, 128>}, {transform_indices = @transform_3, window_bounds = array<i64: 3, 16, 128>}]} {
    %c0 = arith.constant 0 : index
    %c0_0 = arith.constant 0 : index
    %c0_1 = arith.constant 0 : index
    %0 = vector.load %arg1[%c0, %c0_0, %c0_1] : memref<3x1x128xf32, #tpu.memory_space<vmem>>, vector<3x1x128xf32>
    %c0_2 = arith.constant 0 : index
    %c0_3 = arith.constant 0 : index
    %c0_4 = arith.constant 0 : index
    %1 = vector.load %arg4[%c0_2, %c0_3, %c0_4] : memref<3x16x128xf32, #tpu.memory_space<vmem>>, vector<3x1x128xf32>
    tpu.vector_store %arg4[%c0_2, %c0_3, %c0_4], %0 {strides = array<i32>} : memref<3x16x128xf32, #tpu.memory_space<vmem>>, vector<3x1x128xf32>,
    %c0_5 = arith.constant 0 : index
    %c0_6 = arith.constant 0 : index
    %c0_7 = arith.constant 0 : index
    %2 = vector.load %arg2[%c0_5, %c0_6, %c0_7] : memref<1x4x128xf32, #tpu.memory_space<vmem>>, vector<1x4x128xf32>
    %3 = vector.shape_cast %2 : vector<1x4x128xf32> to vector<1x4x128xf32>
    %4 = vector.broadcast %3 : vector<1x4x128xf32> to vector<3x4x128xf32>
    %c0_8 = arith.constant 0 : index
    %c1 = arith.constant 1 : index
    %c0_9 = arith.constant 0 : index
    %5 = vector.load %arg4[%c0_8, %c1, %c0_9] : memref<3x16x128xf32, #tpu.memory_space<vmem>>, vector<3x4x128xf32>
    tpu.vector_store %arg4[%c0_8, %c1, %c0_9], %4 {strides = array<i32>} : memref<3x16x128xf32, #tpu.memory_space<vmem>>, vector<3x4x128xf32>,
    %c0_10 = arith.constant 0 : index
    %c0_11 = arith.constant 0 : index
    %c0_12 = arith.constant 0 : index
    %6 = vector.load %arg3[%c0_10, %c0_11, %c0_12] : memref<3x11x128xf32, #tpu.memory_space<vmem>>, vector<3x11x128xf32>
    %c0_13 = arith.constant 0 : index
    %c5 = arith.constant 5 : index
    %c0_14 = arith.constant 0 : index
    %7 = vector.load %arg4[%c0_13, %c5, %c0_14] : memref<3x16x128xf32, #tpu.memory_space<vmem>>, vector<3x11x128xf32>
    tpu.vector_store %arg4[%c0_13, %c5, %c0_14], %6 {strides = array<i32>} : memref<3x16x128xf32, #tpu.memory_space<vmem>>, vector<3x11x128xf32>,
    return
  }
  func.func @transform_0(%arg0: i32) -> (i32, i32, i32) {
    %c0_i32 = arith.constant 0 : i32
    %c0_i32_0 = arith.constant 0 : i32
    %c0_i32_1 = arith.constant 0 : i32
    return %arg0, %c0_i32, %c0_i32_0 : i32, i32, i32
  }
  func.func @transform_1(%arg0: i32) -> (i32, i32, i32) {
    %c0_i32 = arith.constant 0 : i32
    %c0_i32_0 = arith.constant 0 : i32
    %c0_i32_1 = arith.constant 0 : i32
    %c0_i32_2 = arith.constant 0 : i32
    return %c0_i32, %c0_i32_0, %c0_i32_1 : i32, i32, i32
  }
  func.func @transform_2(%arg0: i32) -> (i32, i32, i32) {
    %c0_i32 = arith.constant 0 : i32
    %c0_i32_0 = arith.constant 0 : i32
    %c0_i32_1 = arith.constant 0 : i32
    return %arg0, %c0_i32, %c0_i32_0 : i32, i32, i32
  }
  func.func @transform_3(%arg0: i32) -> (i32, i32, i32) {
    %c0_i32 = arith.constant 0 : i32
    %c0_i32_0 = arith.constant 0 : i32
    %c0_i32_1 = arith.constant 0 : i32
    return %arg0, %c0_i32, %c0_i32_0 : i32, i32, i32
  }
}

</mosaic_0001>

<bundles_post_ra>
// kernel: tpu_custom_call.1
= control target key start
LH: loop header
LB: loop body
LE: loop exit
PB: predicated region body
PF: predicated region fallthrough
CT: control target
= control target key end

     0   :  { %8 = vsyncpa [#allocation3], 0  ;;  %s956_s0 = inlined_call_operand.hbm [shape: f32[10,1,128], index: 0, kind: input, shape index: {}]   ;;  %s957_s1 = inlined_call_operand.hbm [shape: f32[1,4,128], index: 1, kind: input, shape index: {}]   ;;  %s958_s2 = inlined_call_operand.hbm [shape: f32[10,11,128], index: 2, kind: input, shape index: {}]   ;;  %s959_s3 = inlined_call_operand.hbm [shape: f32[10,16,128], index: 3, kind: output, shape index: {}]  }
   0x1   :  { %10 = vsyncpa [#allocation3 + $0x1], 0 }
   0x2   :  { %11 = vsyncpa [#allocation6], 0 }
   0x3   :  { %12 = vsyncpa [#allocation4], 0 }
   0x4   :  { %14 = vsyncpa [#allocation4 + $0x1], 0  ;;  %s701_s12 = smov 0   ;;  %s703_s13 = smov 0  }
   0x5   :  { %s705_s14 = smov 0   ;;  %s707_s15 = smov 0  }
   0x6 LB: > { %s722_s16 = sadd.s32 4294967295, %s669_s15   ;;  %s418_s17 = sadd.s32 4294967294, %s669_s15   ;;  %s669_s15 = sphi %s707_s15, %s975_s15   ;;  %s665_s14 = sphi %s705_s14, %s974_s14   ;;  %s661_s13 = sphi %s703_s13, %s973_s13   ;;  %s657_s12 = sphi %s701_s12, %s972_s12  }
   0x7   : > { %s726_s18 = sadd.s32 1, %s669_s15   ;;  %s27_s19 = sadd.s32 1, %s665_s14 }
   0x8   : > { %s24_s20 = ssub.s32 %s669_s15, %s726_s18  ;;  %p34_p0 = scmp.ne.s32.totalorder %s665_s14, %s661_s13 }
   0x9   : > { %p25_p1 = scmp.eq.s32.totalorder %s24_s20, 0  ;;  %p35_p2 = scmp.eq.s32.totalorder %s669_s15, 0 }
   0xa   : > { %p40_p3 = scmp.ne.s32.totalorder %s661_s13, %s657_s12  ;;  %p961_p4 = scmp.eq.s32.totalorder %s722_s16, 0 }
   0xb   : > { %s738_s21 = scalar_select %p25_p1, %s665_s14, %s27_s19  }
   0xc   : > { %p740_p5 = por %p35_p2, %p34_p0  ;;  %p746_p6 = por %p961_p4, %p40_p3 }
   0xd   : > { %p111_p7 = scmp.eq.s32.totalorder %s722_s16, 3  ;;  %p117_p8 = scmp.eq.s32.totalorder %s418_s17, 3 }
   0xe   : > { %s963_s23 = scalar_select %p746_p6, 1, 0 }
   0xf   : > { %p419_p9 = scmp.ge.s32.totalorder %s669_s15, 1  ;;  %p124_p10 = scmp.lt.s32.totalorder %s669_s15, 5 }
  0x10   : > { %p753_p11 = por %p111_p7, %p34_p0  ;;  %p757_p12 = por %p117_p8, %p40_p3 }
  0x11   : > { %p761_p13 = pnand %p419_p9, %p124_p10  ;;  %s671_s27 = smov [#allocation5]  }
  0x12   : > { %s964_s24 = scalar_select %p753_p11, 1, 0 }
  0x13   : > { %s965_s25 = scalar_select %p757_p12, 1, 0 }
  0x14   : > { %p469_p1 = pneg %p761_p13  ;;  %s137_s28 = sshll.u32 %s671_s27, 4  ;;  %s138_s28 = int_to_ptr.vmem [resolvable:$true] %s137_s28 }
  0x15   : > { %s530_s29 = scalar_lea.vmem %s138_s28, 64  ;;  %p538_p8 = scmp.lt.s32.totalorder %s138_s28, %s138_s28 }
  0x16   : > { %p470_p2 = pnand %p469_p1, %p961_p4  ;;  %p531_p7 = scmp.ne.s32.totalorder %s138_s28, %s530_s29 }
  0x17   : > { %p539_p6 = scmp.lt.s32.totalorder %s530_s29, %s530_s29 }
  0x18   : > { %p521_p0 = pneg %p470_p2 }
  0x19   : > { %p540_p12 = por %p539_p6, %p538_p8 }
  0x1a   : > { %p533_p11 = pnand %p531_p7, %p521_p0 }
  0x1c   : > { %p534_p3 = pneg %p533_p11 }
  0x1e   : > { %p541_p9 = pnand %p540_p12, %p534_p3 }
  0x20   : > { %544 = shalt.err (!%p541_p9)
}
  0x21   : > { %472 = dma.hbm_to_vmem [thread:$0]  (!%p470_p2), %s957_s1, 64, %s138_s28, [#allocation6]  }
  0x22   : > { %p421_p10 = scmp.ge.s32.totalorder %s669_s15, 4 }
  0x24   : > { %144 = sbr.rel (%p421_p10) target bundleno = 109 (0x6d), region = 20 }
  0x29   : > { %147 = sbr.rel (!%p740_p5) target bundleno = 75 (0x4b), region = 24  ;;  %s148_s5 = sand.u32 (%p740_p5), 1, %s669_s15  }
  0x2a   : > { %s150_s6 = sand.u32 (%p740_p5), 1, %s665_s14   ;;  %s153_s8 = smul.u32 (%p740_p5), 3, %s669_s15 }
  0x2b   : > { %s458_s7 = smul.u32 (%p740_p5), 3, %s150_s6  ;;  %s781_s17 = scalar_lea.sflag (%p740_p5), [#allocation3], %s148_s5 }
  0x2c   : > { %s154_s9 = ssub.s32 (%p740_p5), 10, %s153_s8 }
  0x2d   : > { %p155_p6 = scmp.lt.s32.totalorder (%p740_p5), %s154_s9, 3  ;;  %s152_s19 = scalar_lea.vmem (%p740_p5), [#allocation2], %s458_s7 }
  0x2f   : > { %s977_s9 = smov (!%p155_p6, %s154_s9), 3 }
  0x30   : > { %s778_s10 = sshll.u32 %s977_s9, 4 }
  0x31   : > { %s159_s11 = ssub.s32 48, %s778_s10 }
  0x32   : > { %160 = vsyncadd %s781_s17, %s159_s11  ;;  %p423_p11 = scmp.ne.s32.totalorder %s778_s10, 0  ;;  %s445_s20 = smul.u32 48, %s669_s15 }
  0x33   : > { %s164_s27 = sshll.u32 %s152_s19, 4  ;;  %s549_s7 = scalar_lea.hbm %s956_s0, 160  ;;  %s791_s27 = int_to_ptr.vmem [resolvable:$true] %s164_s27 }
  0x34   : > { %s789_s30 = scalar_lea.hbm %s956_s0, %s445_s20 }
  0x35   : > { %s545_s4 = scalar_lea.hbm %s789_s30, %s778_s10  ;;  %p550_p0 = scmp.lt.s32.totalorder %s789_s30, %s956_s0 }
  0x36   : > { %p546_p12 = scmp.ne.s32.totalorder %s789_s30, %s545_s4  ;;  %p551_p7 = scmp.lt.s32.totalorder %s549_s7, %s545_s4 }
  0x38   : > { %p547_p1 = pnand %p546_p12, %p423_p11  ;;  %p552_p3 = por %p551_p7, %p550_p0 }
  0x3a   : > { %p548_p2 = pneg %p547_p1 }
  0x3c   : > { %p553_p8 = pnand %p552_p3, %p548_p2 }
  0x3e   : > { %556 = shalt.err (!%p553_p8)
}
  0x3f   : > { %s557_s11 = scalar_lea.vmem %s791_s27, %s778_s10  ;;  %s672_s19 = smov [#allocation2]  }
  0x40   : > { %p558_p9 = scmp.ne.s32.totalorder %s791_s27, %s557_s11  ;;  %s561_s20 = sshll.u32 %s672_s19, 4  ;;  %s562_s20 = int_to_ptr.vmem [resolvable:$false] %s561_s20 }
  0x41   : > { %s563_s28 = scalar_lea.vmem %s562_s20, 96  ;;  %p564_p12 = scmp.lt.s32.totalorder %s791_s27, %s562_s20 }
  0x42   : > { %p559_p10 = pnand %p558_p9, %p423_p11  ;;  %p565_p1 = scmp.lt.s32.totalorder %s563_s28, %s557_s11 }
  0x44   : > { %p560_p6 = pneg %p559_p10  ;;  %p566_p4 = por %p565_p1, %p564_p12 }
  0x46   : > { %p567_p0 = pnand %p566_p4, %p560_p6 }
  0x48   : > { %570 = shalt.err (!%p567_p0)
}
  0x49   : > { %s673_s29 = smov 16   ;;  %s674_s4 = smov 1  }
  0x4a   : > { %170 = dma.hbm_to_vmem [thread:$0]  (%p423_p11), %s789_s30, %s778_s10, %s791_s27, %s781_s17, %s673_s29, %s673_s29, %s674_s4  }
  0x4b PF: > { %173 = sbr.rel (!%p740_p5) target bundleno = 109 (0x6d), region = 28  ;;  %s174_s5 = sand.u32 (%p740_p5), 1, %s669_s15  }
  0x4c   : > { %s176_s6 = sand.u32 (%p740_p5), 1, %s665_s14   ;;  %s179_s8 = smul.u32 (%p740_p5), 3, %s669_s15 }
  0x4d   : > { %s459_s7 = smul.u32 (%p740_p5), 48, %s176_s6  ;;  %s825_s20 = scalar_lea.sflag (%p740_p5), [#allocation3], %s174_s5 }
  0x4e   : > { %s180_s9 = ssub.s32 (%p740_p5), 10, %s179_s8 }
  0x4f   : > { %p181_p4 = scmp.lt.s32.totalorder (%p740_p5), %s180_s9, 3  ;;  %s178_s10 = scalar_lea.vmem (%p740_p5), [#allocation7], %s459_s7 }
  0x51   : > { %s979_s9 = smov (!%p181_p4, %s180_s9), 3 }
  0x52   : > { %s822_s11 = sshll.u32 %s979_s9, 8 }
  0x53   : > { %s186_s19 = ssub.s32 768, %s822_s11 }
  0x54   : > { %187 = vsyncadd %s825_s20, %s186_s19  ;;  %p427_p5 = scmp.ne.s32.totalorder %s822_s11, 0  ;;  %s456_s22 = smul.u32 768, %s669_s15 }
  0x55   : > { %s194_s17 = sshll.u32 %s178_s10, 4  ;;  %s575_s6 = scalar_lea.hbm %s958_s2, 2560  ;;  %s835_s17 = int_to_ptr.vmem [resolvable:$true] %s194_s17 }
  0x56   : > { %s833_s28 = scalar_lea.hbm %s958_s2, %s456_s22 }
  0x57   : > { %s571_s29 = scalar_lea.hbm %s833_s28, %s822_s11  ;;  %p576_p3 = scmp.lt.s32.totalorder %s833_s28, %s958_s2 }
  0x58   : > { %p572_p11 = scmp.ne.s32.totalorder %s833_s28, %s571_s29  ;;  %p577_p8 = scmp.lt.s32.totalorder %s575_s6, %s571_s29 }
  0x5a   : > { %p573_p2 = pnand %p572_p11, %p427_p5  ;;  %p578_p9 = por %p577_p8, %p576_p3 }
  0x5c   : > { %p574_p7 = pneg %p573_p2 }
  0x5e   : > { %p579_p10 = pnand %p578_p9, %p574_p7 }
  0x60   : > { %582 = shalt.err (!%p579_p10)
}
  0x61   : > { %s583_s9 = scalar_lea.vmem %s835_s17, %s822_s11  ;;  %s675_s19 = smov [#allocation7]  }
  0x62   : > { %p584_p6 = scmp.ne.s32.totalorder %s835_s17, %s583_s9  ;;  %s587_s10 = sshll.u32 %s675_s19, 4  ;;  %s588_s10 = int_to_ptr.vmem [resolvable:$false] %s587_s10 }
  0x63   : > { %s589_s22 = scalar_lea.vmem %s588_s10, 1536  ;;  %p590_p0 = scmp.lt.s32.totalorder %s835_s17, %s588_s10 }
  0x64   : > { %p585_p12 = pnand %p584_p6, %p427_p5  ;;  %p591_p4 = scmp.lt.s32.totalorder %s589_s22, %s583_s9 }
  0x66   : > { %p586_p1 = pneg %p585_p12  ;;  %p592_p11 = por %p591_p4, %p590_p0 }
  0x68   : > { %p593_p2 = pnand %p592_p11, %p586_p1 }
  0x6a   : > { %596 = shalt.err (!%p593_p2)
}
  0x6b   : > { %s676_s27 = smov 128   ;;  %s677_s30 = smov 8  }
  0x6c   : > { %200 = dma.hbm_to_vmem [thread:$0]  (%p427_p5), %s833_s28, %s822_s11, %s835_s17, %s825_s20, %s676_s27, %s676_s27, %s677_s30  }
  0x6d PF: > { %206 = sbr.rel (%p761_p13) target bundleno = 161 (0xa1), region = 32  ;;  %s208_s29 = sand.u32 (!%p761_p13), 1, %s722_s16  }
  0x6e   : > { %s865_s4 = sand.u32 (!%p761_p13), 1, %s661_s13   ;;  %s209_s6 = scalar_lea.sflag (!%p761_p13), [#allocation3], %s208_s29 }
  0x6f   : > { %s460_s5 = smul.u32 (!%p761_p13), 3, %s865_s4  ;;  %p967_p7 = scmp.ne.s32.totalorder (!%p761_p13), %s963_s23, 0 }
  0x71   : > { %s212_s7 = scalar_lea.vmem (!%p761_p13), [#allocation2], %s460_s5 }
  0x72   : > { %640 = dma.done.wait (%p967_p7), %s209_s6, 48  }
  0x73   : > { %642 = vsyncadd (%p967_p7), %s209_s6, 4294967248  ;;  %p968_p5 = scmp.eq.s32.totalorder %s722_s16, 0 }
  0x75   : > { %644 = dma.done.wait (%p968_p5), [#allocation6], 64   ;;  %p969_p13 = pmov %p968_p5 }
  0x76   : > { %s461_s26 = smul.u32 48, %s865_s4 }
  0x77   : > { %646 = vsyncadd (%p969_p13), [#allocation6], 4294967232 }
  0x78   : > { %s225_s11 = scalar_lea.vmem [#allocation7], %s461_s26 }
  0x79   : > { %648 = dma.done.wait (%p967_p7), %s209_s6, 768  }
  0x7a   : > { %650 = vsyncadd (%p967_p7), %s209_s6, 4294966528  ;;  %v270_v0 = vld [vmem:[%s212_s7] sm:$0x1]  ;;  %v271_v1 = vld [vmem:[%s212_s7 + $0x1] sm:$0x1]  ;;  %s881_s20 = scalar_lea.vmem [#allocation8], %s461_s26 }
  0x7b   : > { %v272_v2 = vld [vmem:[%s212_s7 + $0x2] sm:$0x1]  ;;  %273 = vst [vmem:[%s881_s20] sm:$0x1] %v270_v0  ;;  %274 = vst [vmem:[%s881_s20 + $0x10] sm:$0x1] %v271_v1  ;;  %v280_v4 = vld [vmem:[%s225_s11] sm:$0xff] }
  0x7c   : > { %275 = vst [vmem:[%s881_s20 + $0x20] sm:$0x1] %v272_v2  ;;  %v276_v3 = vld [vmem:[#allocation5] sm:$0xf]  ;;  %v281_v5 = vld [vmem:[%s225_s11 + $0x8] sm:$0x7] }
  0x7d   : > { %277 = vst [vmem:[%s881_s20 + $0x1] sm:$0xf] %v276_v3  ;;  %278 = vst [vmem:[%s881_s20 + $0x11] sm:$0xf] %v276_v3  ;;  %v282_v6 = vld [vmem:[%s225_s11 + $0x10] sm:$0xff]  ;;  %v284_v8 = vld [vmem:[%s225_s11 + $0x20] sm:$0xff] }
  0x7e   : > { %279 = vst [vmem:[%s881_s20 + $0x21] sm:$0xf] %v276_v3  ;;  %286 = vst [vmem:[%s881_s20 + $0x5] sm:$0xff] %v280_v4  ;;  %v283_v7 = vld [vmem:[%s225_s11 + $0x18] sm:$0x7]  ;;  %s293_s23 = scalar_lea.sflag [#allocation4], %s865_s4 }
  0x7f   : > { %287 = vst [vmem:[%s881_s20 + $0xd] sm:$0x7] %v281_v5  ;;  %288 = vst [vmem:[%s881_s20 + $0x15] sm:$0xff] %v282_v6  ;;  %v285_v9 = vld [vmem:[%s225_s11 + $0x28] sm:$0x7]  ;;  %p970_p3 = scmp.ne.s32.totalorder %s964_s24, 0 }
  0x80   : > { %289 = vst [vmem:[%s881_s20 + $0x1d] sm:$0x7] %v283_v7  ;;  %290 = vst [vmem:[%s881_s20 + $0x25] sm:$0xff] %v284_v8  ;;  %s300_s17 = smul.u32 (%p970_p3), 3, %s722_s16 }
  0x81   : > { %291 = vst [vmem:[%s881_s20 + $0x2d] sm:$0x7] %v285_v9  ;;  %299 = sbr.rel (!%p970_p3) target bundleno = 161 (0xa1), region = 48 }
  0x82   : > { %s301_s28 = ssub.s32 (%p970_p3), 10, %s300_s17 }
  0x83   : > { %p302_p8 = scmp.lt.s32.totalorder (%p970_p3), %s301_s28, 3 }
  0x86   : > { %s981_s28 = smov (!%p302_p8, %s301_s28), 3 }
  0x87   : > { %s899_s8 = sshll.u32 %s981_s28, 8 }
  0x88   : > { %s307_s9 = ssub.s32 768, %s899_s8 }
  0x89   : > { %308 = vsyncadd %s293_s23, %s307_s9  ;;  %p437_p9 = scmp.ne.s32.totalorder %s899_s8, 0  ;;  %s457_s24 = smul.u32 768, %s722_s16 }
  0x8a   : > { %s315_s19 = sshll.u32 %s881_s20, 4  ;;  %s678_s29 = smov [#allocation8]   ;;  %s912_s19 = int_to_ptr.vmem [resolvable:$true] %s315_s19 }
  0x8b   : > { %s910_s27 = scalar_lea.hbm %s959_s3, %s457_s24  ;;  %s597_s30 = scalar_lea.vmem %s912_s19, %s899_s8 }
  0x8c   : > { %p598_p10 = scmp.ne.s32.totalorder %s912_s19, %s597_s30  ;;  %s601_s5 = sshll.u32 %s678_s29, 4  ;;  %s602_s5 = int_to_ptr.vmem [resolvable:$false] %s601_s5 }
  0x8d   : > { %s603_s16 = scalar_lea.vmem %s602_s5, 1536  ;;  %p604_p1 = scmp.lt.s32.totalorder %s912_s19, %s602_s5 }
  0x8e   : > { %p599_p6 = pnand %p598_p10, %p437_p9  ;;  %p605_p0 = scmp.lt.s32.totalorder %s603_s16, %s597_s30 }
  0x90   : > { %p600_p12 = pneg %p599_p6  ;;  %p606_p4 = por %p605_p0, %p604_p1 }
  0x92   : > { %p607_p11 = pnand %p606_p4, %p600_p12 }
  0x94   : > { %610 = shalt.err (!%p607_p11)
}
  0x95   : > { %s611_s6 = scalar_lea.hbm %s910_s27, %s899_s8  ;;  %s615_s11 = scalar_lea.hbm %s959_s3, 2560 }
  0x96   : > { %p612_p2 = scmp.ne.s32.totalorder %s910_s27, %s611_s6  ;;  %p616_p13 = scmp.lt.s32.totalorder %s910_s27, %s959_s3 }
  0x97   : > { %p617_p3 = scmp.lt.s32.totalorder %s615_s11, %s611_s6 }
  0x98   : > { %p613_p7 = pnand %p612_p2, %p437_p9 }
  0x99   : > { %p618_p8 = por %p617_p3, %p616_p13 }
  0x9a   : > { %p614_p5 = pneg %p613_p7 }
  0x9c   : > { %p619_p10 = pnand %p618_p8, %p614_p5 }
  0x9e   : > { %622 = shalt.err (!%p619_p10)
}
  0x9f   : > { %s679_s28 = smov 128   ;;  %s680_s9 = smov 8  }
  0xa0   : > { %321 = dma.vmem_to_hbm [thread:$0]  (%p437_p9), %s912_s19, %s899_s8, %s910_s27, %s293_s23, %s679_s28, %s679_s28, %s680_s9  }
  0xa1 PF: > { %p479_p6 = scmp.ge.s32.totalorder %s669_s15, 2  ;;  %s330_s24 = sand.u32 1, %s657_s12  }
  0xa2   : > { %p971_p12 = scmp.ne.s32.totalorder %s965_s25, 0  ;;  %s331_s10 = scalar_lea.sflag [#allocation4], %s330_s24 }
  0xa4   : > { %p474_p1 = pnand %p479_p6, %p971_p12 }
  0xa6   : > { %p475_p0 = pneg %p474_p1 }
  0xa8   : > { %652 = dma.done.wait (%p475_p0), %s331_s10, 768  }
  0xa9   : > { %654 = vsyncadd (%p475_p0), %s331_s10, 4294966528  ;;  %p17_p4 = scmp.ge.s32.totalorder %s726_s18, 6   ;;  %s972_s12 = smov %s661_s13 }
  0xaa   : > { %s973_s13 = smov %s665_s14  ;;  %s974_s14 = smov %s738_s21 }
  0xab   : > { %s975_s15 = smov %s726_s18  ;;  %19 = sbr.rel (!%p17_p4) target bundleno = 6 (0x6), region = 92 }
  0xb0   :  { %336 = vsyncpa [#allocation3], 1 }
  0xb1   :  { %338 = vsyncpa [#allocation3 + $0x1], 1 }
  0xb2   :  { %339 = vsyncpa [#allocation6], 1 }
  0xb3   :  { %340 = vsyncpa [#allocation4], 1 }
  0xb4   :  { %342 = vsyncpa [#allocation4 + $0x1], 1 }

</bundles_post_ra>
